<compile_context>
chip_gen: v7x
topology: tpu7x:2x2x1
jax: 0.10.0
libtpu: 0.0.40
codegen_flags: <defaults>
</compile_context>

<pallas_src>
import functools

import numpy as np
import jax
import jax.numpy as jnp
from jax.experimental import pallas as pl
from jax.experimental.pallas import tpu as pltpu


# ---------------------------------------------------------------------------
# Helpers
# ---------------------------------------------------------------------------
def _round_up(x, m):
    return ((x + m - 1) // m) * m


def _pick_tk(Kp, max_tk):
    """Largest K tile <= max_tk that divides Kp (Kp is a multiple of 128 for
    all prepared weights; tiny raw K like the bilinear matrices fall through)."""
    if Kp <= max_tk:
        return Kp
    tk = (min(max_tk, Kp) // 128) * 128
    while tk > 128 and Kp % tk != 0:
        tk -= 128
    if Kp % tk != 0:          # safety net (never hit for prepared weights)
        return Kp
    return tk


def _maybe_buffered_spec(shape, index_map, buffers=None):
    """BlockSpec with deeper pipelining if this JAX version supports it."""
    if buffers is not None and hasattr(pl, "Buffered"):
        try:
            return pl.BlockSpec(shape, index_map,
                                pipeline_mode=pl.Buffered(buffers))
        except TypeError:
            pass
    return pl.BlockSpec(shape, index_map)


# ---------------------------------------------------------------------------
# Fused matmul kernel: out = act((A @ B) * scale + bias [+ residual])
#   act = ReLU (all columns) or per-column masked ReLU or identity
# ---------------------------------------------------------------------------
def _mm_kernel(*refs, nk, relu, has_mask, has_res):
    a_ref, b_ref, s_ref, c_ref = refs[:4]
    idx = 4
    m_ref = r_ref = None
    if has_mask:
        m_ref = refs[idx]
        idx += 1
    if has_res:
        r_ref = refs[idx]
        idx += 1
    o_ref, acc_ref = refs[idx], refs[idx + 1]

    k = pl.program_id(2)

    @pl.when(k == 0)
    def _():
        acc_ref[...] = jnp.zeros_like(acc_ref)

    acc_ref[...] += jnp.dot(a_ref[...], b_ref[...],
                            preferred_element_type=jnp.float32)

    @pl.when(k == nk - 1)
    def _():
        out = acc_ref[...] * s_ref[...] + c_ref[...]
        if has_res:
            out = out + r_ref[...].astype(jnp.float32)
        if relu:
            out = jnp.maximum(out, 0.0)
        elif has_mask:
            out = jnp.where(m_ref[...] > 0.0, jnp.maximum(out, 0.0), out)
        o_ref[...] = out.astype(o_ref.dtype)


@functools.partial(jax.jit, static_argnames=("relu", "out_dtype"))
def matmul_fused(a, b, scale, bias, residual=None, relu_mask=None, *,
                 relu=False, out_dtype=jnp.bfloat16):
    """a:(M,K)  b:(Kp,Nc) pre-padded along K  scale/bias:(...,Nc) f32."""
    M, K = a.shape
    Kp, Nc = b.shape
    assert not (relu and relu_mask is not None)

    # Big K tiles when M is small (weight-DMA / step-overhead bound regime).
    max_tk = 2048 if M <= 256 else 512
    tk = _pick_tk(Kp, max_tk)
    nk = Kp // tk

    a = a.astype(jnp.bfloat16)
    b = b.astype(jnp.bfloat16)
    if Kp != K:
        a = jnp.pad(a, ((0, 0), (0, Kp - K)))

    tm = min(512, _round_up(M, 8))
    tn = Nc if Nc <= 512 else 512
    grid_m = pl.cdiv(M, tm)
    grid_n = pl.cdiv(Nc, tn)
    # v7x dual-TC: always keep >= 2 parallel output blocks alive.
    if grid_m * grid_n == 1:
        if Nc >= 256:
            tn = max(128, ((Nc // 2) // 128) * 128)
            grid_n = pl.cdiv(Nc, tn)
        elif M >= 16:
            tm = _round_up(pl.cdiv(M, 2), 8)
            grid_m = pl.cdiv(M, tm)

    scale = scale.reshape(1, Nc).astype(jnp.float32)
    bias = bias.reshape(1, Nc).astype(jnp.float32)

    has_res = residual is not None
    has_mask = relu_mask is not None

    nbuf_b = 3 if nk > 1 else None        # triple-buffer weights only on long K loops
    b_spec = _maybe_buffered_spec((tk, tn), lambda i, j, k: (k, j), buffers=nbuf_b)
    in_specs = [
        pl.BlockSpec((tm, tk), lambda i, j, k: (i, k)),
        b_spec,
        pl.BlockSpec((1, tn), lambda i, j, k: (0, j)),
        pl.BlockSpec((1, tn), lambda i, j, k: (0, j)),
    ]
    operands = [a, b, scale, bias]
    if has_mask:
        in_specs.append(pl.BlockSpec((1, tn), lambda i, j, k: (0, j)))
        operands.append(relu_mask.reshape(1, Nc).astype(jnp.float32))
    if has_res:
        in_specs.append(pl.BlockSpec((tm, tn), lambda i, j, k: (i, j)))
        operands.append(residual.reshape(M, Nc).astype(jnp.bfloat16))

    # VMEM limit derived from the actual tile footprint (keep <= 32 MiB; v7x
    # has only 64 MiB per TensorCore).
    out_bytes = jnp.dtype(out_dtype).itemsize
    footprint = (2 * tm * tk * 2 + (nbuf_b or 2) * tk * tn * 2
                 + 2 * tm * tn * out_bytes + tm * tn * 4 + 8 * tn * 4)
    if has_res:
        footprint += 2 * tm * tn * 2
    vmem_limit = int(min(32 * 1024 * 1024,
                         max(8 * 1024 * 1024, footprint * 3 // 2)))

    return pl.pallas_call(
        functools.partial(_mm_kernel, nk=nk, relu=relu,
                          has_mask=has_mask, has_res=has_res),
        out_shape=jax.ShapeDtypeStruct((M, Nc), out_dtype),
        grid_spec=pltpu.PrefetchScalarGridSpec(
            num_scalar_prefetch=0,
            grid=(grid_m, grid_n, nk),
            in_specs=in_specs,
            out_specs=pl.BlockSpec((tm, tn), lambda i, j, k: (i, j)),
            scratch_shapes=[pltpu.VMEM((tm, tn), jnp.float32)],
        ),
        compiler_params=pltpu.CompilerParams(
            dimension_semantics=("parallel", "parallel", "arbitrary"),
            vmem_limit_bytes=vmem_limit,
        ),
    )(*operands)


# ---------------------------------------------------------------------------
# Single-pass 3x3/stride-2/pad-1 max-pool.
# The padded tensor is split (cheaply, in XLA) into 4 even/odd row/col
# quadrants; one kernel reads each quadrant once and forms all 9 taps with
# contiguous in-kernel slices.
# ---------------------------------------------------------------------------
def _maxpool_kernel(ee_ref, eo_ref, oe_ref, oo_ref, o_ref):
    oh, ow = o_ref.shape[1], o_ref.shape[2]
    ee = ee_ref[...]
    eo = eo_ref[...]
    oe = oe_ref[...]
    oo = oo_ref[...]
    m = ee[:, :oh, :ow, :]
    m = jnp.maximum(m, eo[:, :oh, :, :])
    m = jnp.maximum(m, ee[:, :oh, 1:ow + 1, :])
    m = jnp.maximum(m, oe[:, :, :ow, :])
    m = jnp.maximum(m, oo)
    m = jnp.maximum(m, oe[:, :, 1:ow + 1, :])
    m = jnp.maximum(m, ee[:, 1:oh + 1, :ow, :])
    m = jnp.maximum(m, eo[:, 1:oh + 1, :, :])
    m = jnp.maximum(m, ee[:, 1:oh + 1, 1:ow + 1, :])
    o_ref[...] = m


@jax.jit
def maxpool3x3_s2_p1(x):
    """PyTorch nn.MaxPool2d(3, stride=2, padding=1) on NHWC input (float)."""
    N, H, W, C = x.shape
    assert jnp.issubdtype(x.dtype, jnp.floating), "maxpool expects float input"
    neg = jnp.finfo(x.dtype).min
    OH = (H - 1) // 2 + 1
    OW = (W - 1) // 2 + 1
    xp = jnp.pad(x, ((0, 0), (1, 1), (1, 1), (0, 0)), constant_values=neg)
    er = xp[:, 0::2, :, :][:, :OH + 1]          # even padded rows
    od = xp[:, 1::2, :, :][:, :OH]              # odd padded rows
    ee = er[:, :, 0::2, :][:, :, :OW + 1]
    eo = er[:, :, 1::2, :][:, :, :OW]
    oe = od[:, :, 0::2, :][:, :, :OW + 1]
    oo = od[:, :, 1::2, :][:, :, :OW]

    def spec(arr):
        return pl.BlockSpec((1,) + arr.shape[1:], lambda n: (n, 0, 0, 0))

    return pl.pallas_call(
        _maxpool_kernel,
        out_shape=jax.ShapeDtypeStruct((N, OH, OW, C), x.dtype),
        grid_spec=pltpu.PrefetchScalarGridSpec(
            num_scalar_prefetch=0,
            grid=(N,),
            in_specs=[spec(ee), spec(eo), spec(oe), spec(oo)],
            out_specs=pl.BlockSpec((1, OH, OW, C), lambda n: (n, 0, 0, 0)),
        ),
        compiler_params=pltpu.CompilerParams(
            dimension_semantics=("parallel",),
        ),
    )(ee, eo, oe, oo)


# ---------------------------------------------------------------------------
# Conv wrapper (im2col glue -> fused Pallas matmul), jitted per layer so the
# glue (pad/slice/concat/reshape) fuses with the pallas_call dispatch.
# ---------------------------------------------------------------------------
@functools.partial(jax.jit, static_argnames=("kh", "kw", "stride", "padding",
                                             "dilation", "relu", "out_dtype"))
def _conv2d_impl(x, w, scale, bias, residual, relu_mask, *, kh, kw, stride,
                 padding, dilation, relu, out_dtype):
    N, H, W, C = x.shape
    Cout = w.shape[1]
    if padding > 0:
        x = jnp.pad(x, ((0, 0), (padding, padding), (padding, padding), (0, 0)))
    Hp, Wp = H + 2 * padding, W + 2 * padding
    OH = (Hp - (dilation * (kh - 1) + 1)) // stride + 1
    OW = (Wp - (dilation * (kw - 1) + 1)) // stride + 1

    if kh == 1 and kw == 1:
        col = x[:, ::stride, ::stride, :][:, :OH, :OW, :].reshape(N * OH * OW, C)
    else:
        # TODO(synk): im2col is still materialized by XLA; folding the kh*kw
        # taps into the matmul K grid axis needs unaligned element-offset
        # activation windows that standard BlockSpecs cannot express safely.
        cols = []
        for i in range(kh):
            for j in range(kw):
                hs, ws = i * dilation, j * dilation
                patch = x[:, hs:hs + stride * (OH - 1) + 1:stride,
                             ws:ws + stride * (OW - 1) + 1:stride, :]
                cols.append(patch)
        col = jnp.concatenate(cols, axis=-1).reshape(N * OH * OW, kh * kw * C)

    res = None if residual is None else residual.reshape(N * OH * OW, Cout)
    out = matmul_fused(col, w, scale, bias, res, relu_mask,
                       relu=relu, out_dtype=out_dtype)
    return out.reshape(N, OH, OW, Cout)


def conv2d(x, cp, *, stride=1, padding=0, dilation=1, relu=False,
           residual=None, relu_mask=None, out_dtype=jnp.bfloat16):
    return _conv2d_impl(x, cp["w"], cp["scale"], cp["bias"], residual, relu_mask,
                        kh=cp["kh"], kw=cp["kw"], stride=stride, padding=padding,
                        dilation=dilation, relu=relu, out_dtype=out_dtype)


# ---------------------------------------------------------------------------
# Bilinear upsample (align_corners=False), batched over N, lane-dense output,
# written directly in NCHW.
# ---------------------------------------------------------------------------
def _bilinear_matrix(out_size, in_size):
    if in_size == out_size:
        return np.eye(out_size, dtype=np.float32)
    scale = in_size / out_size
    m = np.zeros((out_size, in_size), dtype=np.float32)
    for i in range(out_size):
        src = max((i + 0.5) * scale - 0.5, 0.0)
        i0 = min(int(np.floor(src)), in_size - 1)
        i1 = min(i0 + 1, in_size - 1)
        l1 = min(max(src - i0, 0.0), 1.0)
        m[i, i0] += 1.0 - l1
        m[i, i1] += l1
    return m


@functools.partial(jax.jit, static_argnames=("out_h", "out_w", "n_classes"))
def upsample_bilinear_to_nchw(y, *, out_h, out_w, n_classes):
    """y: (N, h, w, C[padded]) -> (N, n_classes, out_h, out_w) f32."""
    N, h, w, C = y.shape
    Mh = jnp.asarray(_bilinear_matrix(out_h, h), jnp.bfloat16)        # (out_h, h)
    ow_pad = out_w if out_w % 128 == 0 else _round_up(out_w, 128)
    mw = np.zeros((w, ow_pad), np.float32)
    mw[:, :out_w] = _bilinear_matrix(out_w, w).T
    MwT = jnp.asarray(mw, jnp.bfloat16)                               # (w, ow_pad)

    # height pass, batched over N: (out_h, h) @ (h, N*w*C); channels stay on lanes
    t = jnp.transpose(y, (1, 0, 2, 3)).reshape(h, N * w * C).astype(jnp.bfloat16)
    th = matmul_fused(Mh, t,
                      jnp.ones((1, N * w * C), jnp.float32),
                      jnp.zeros((1, N * w * C), jnp.float32),
                      out_dtype=jnp.bfloat16)
    # (out_h, N, w, C) -> (N, C, out_h, w) : small transpose only
    th = jnp.transpose(th.reshape(out_h, N, w, C), (1, 3, 0, 2))
    th = th.reshape(N * C * out_h, w)
    # width pass: (N*C*out_h, w) @ (w, ow_pad); lane-dense f32 output in NCHW
    o = matmul_fused(th, MwT,
                     jnp.ones((1, ow_pad), jnp.float32),
                     jnp.zeros((1, ow_pad), jnp.float32),
                     out_dtype=jnp.float32)
    o = o.reshape(N, C, out_h, ow_pad)
    return o[:, :n_classes, :, :out_w]


# ---------------------------------------------------------------------------
# Deterministic synthetic parameters (same shapes as torchvision model)
# ---------------------------------------------------------------------------
class ParamGen:
    def __init__(self, seed=0):
        self.key = jax.random.PRNGKey(seed)

    def take(self):
        self.key, sub = jax.random.split(self.key)
        return sub

    def conv(self, kh, kw, cin, cout):
        std = 1.0 / np.sqrt(kh * kw * cin)
        return std * jax.random.normal(self.take(), (kh, kw, cin, cout), jnp.float32)

    def bn_fold(self, c, eps=1e-5):
        gamma = 1.0 + 0.1 * jax.random.normal(self.take(), (c,), jnp.float32)
        beta = 0.05 * jax.random.normal(self.take(), (c,), jnp.float32)
        mean = 0.05 * jax.random.normal(self.take(), (c,), jnp.float32)
        var = 1.0 + 0.1 * jax.random.uniform(self.take(), (c,), jnp.float32)
        scale = gamma / jnp.sqrt(var + eps)
        bias = beta - mean * scale
        return scale, bias


def prep_conv(w, scale, bias, cout_pad_to=None):
    """Weight -> (Kp, Cout_p) bf16 (K padded to a multiple of 128, optional
    Cout padding for lane-dense stores); scale/bias -> (1, Cout_p) f32."""
    kh, kw, cin, cout = w.shape
    K = kh * kw * cin
    Kp = _round_up(K, 128)
    wm = jnp.reshape(w, (K, cout))
    scale = jnp.reshape(scale, (cout,)).astype(jnp.float32)
    bias = jnp.reshape(bias, (cout,)).astype(jnp.float32)
    cout_p = cout if cout_pad_to is None else _round_up(cout, cout_pad_to)
    if cout_p != cout:
        wm = jnp.pad(wm, ((0, 0), (0, cout_p - cout)))
        scale = jnp.pad(scale, (0, cout_p - cout), constant_values=1.0)
        bias = jnp.pad(bias, (0, cout_p - cout))
    if Kp != K:
        wm = jnp.pad(wm, ((0, Kp - K), (0, 0)))
    return {
        "w": wm.astype(jnp.bfloat16),
        "scale": scale.reshape(1, cout_p),
        "bias": bias.reshape(1, cout_p),
        "kh": kh, "kw": kw,
    }


def _make_bottleneck_params(pg, inplanes, planes, has_ds, fuse_ds):
    p = {}
    w1 = pg.conv(1, 1, inplanes, planes)
    s1, b1 = pg.bn_fold(planes)
    w2 = pg.conv(3, 3, planes, planes)
    s2, b2 = pg.bn_fold(planes)
    w3 = pg.conv(1, 1, planes, planes * 4)
    s3, b3 = pg.bn_fold(planes * 4)
    p["c2"] = prep_conv(w2, s2, b2)
    p["c3"] = prep_conv(w3, s3, b3)
    if has_ds:
        wd = pg.conv(1, 1, inplanes, planes * 4)
        sd, bd = pg.bn_fold(planes * 4)
    if has_ds and fuse_ds:
        # conv1 (1x1, s1) and the stride-1 downsample (1x1) read the same x:
        # fuse into one matmul (Cout concat); per-column ReLU mask applies ReLU
        # only to the conv1 half in the kernel epilogue.
        wcat = jnp.concatenate([w1, wd], axis=3)
        scat = jnp.concatenate([s1, sd])
        bcat = jnp.concatenate([b1, bd])
        p["c1d"] = prep_conv(wcat, scat, bcat)
        p["c1d_mask"] = jnp.concatenate(
            [jnp.ones((planes,), jnp.float32),
             jnp.zeros((planes * 4,), jnp.float32)]).reshape(1, -1)
    else:
        p["c1"] = prep_conv(w1, s1, b1)
        if has_ds:
            p["cd"] = prep_conv(wd, sd, bd)
    return p


def build_params(seed=0):
    pg = ParamGen(seed)
    params = {}
    s1, b1 = pg.bn_fold(64)
    params["conv1"] = prep_conv(pg.conv(7, 7, 3, 64), s1, b1)

    # resnet50 with replace_stride_with_dilation = [False, True, True]
    cfg = [(64, 3, 1, False), (128, 4, 2, False), (256, 6, 2, True), (512, 3, 2, True)]
    inplanes, dilation = 64, 1
    layers = []
    for planes, nblocks, stride, dilate in cfg:
        prev_dilation = dilation
        if dilate:
            dilation *= stride
            stride = 1
        has_ds = (stride != 1) or (inplanes != planes * 4)
        fuse_ds = has_ds and stride == 1
        blocks = [dict(p=_make_bottleneck_params(pg, inplanes, planes, has_ds, fuse_ds),
                       stride=stride, dilation=prev_dilation, has_ds=has_ds,
                       planes=planes)]
        inplanes = planes * 4
        for _ in range(1, nblocks):
            blocks.append(dict(p=_make_bottleneck_params(pg, inplanes, planes, False, False),
                               stride=1, dilation=dilation, has_ds=False,
                               planes=planes))
        layers.append(blocks)
    params["layers"] = layers

    # classifier: FCNHead(2048), classifier[4] replaced -> 29 classes (Cout padded to 128)
    s, b = pg.bn_fold(512)
    params["cls1"] = prep_conv(pg.conv(3, 3, 2048, 512), s, b)
    params["cls2"] = prep_conv(pg.conv(1, 1, 512, 29),
                               jnp.ones((29,), jnp.float32),
                               0.01 * jax.random.normal(pg.take(), (29,), jnp.float32),
                               cout_pad_to=128)
    # aux classifier: FCNHead(1024) -> 21 classes (Cout padded to 128)
    s, b = pg.bn_fold(256)
    params["aux1"] = prep_conv(pg.conv(3, 3, 1024, 256), s, b)
    params["aux2"] = prep_conv(pg.conv(1, 1, 256, 21),
                               jnp.ones((21,), jnp.float32),
                               0.01 * jax.random.normal(pg.take(), (21,), jnp.float32),
                               cout_pad_to=128)
    return params


# ---------------------------------------------------------------------------
# Forward pass
# ---------------------------------------------------------------------------
def bottleneck(x, blk):
    p, stride, dilation = blk["p"], blk["stride"], blk["dilation"]
    planes = blk["planes"]
    if "c1d" in p:
        # fused conv1 + downsample (both 1x1, stride 1): one matmul over x
        both = conv2d(x, p["c1d"], relu_mask=p["c1d_mask"])
        out = both[..., :planes]            # already ReLU'd via column mask
        identity = both[..., planes:]       # no ReLU (raw downsample output)
    else:
        out = conv2d(x, p["c1"], relu=True)
        identity = conv2d(x, p["cd"], stride=stride) if blk["has_ds"] else x
    out = conv2d(out, p["c2"], stride=stride, padding=dilation,
                 dilation=dilation, relu=True)
    # residual add + ReLU fused into the last-K epilogue of this 1x1 matmul
    out = conv2d(out, p["c3"], relu=True, residual=identity)
    return out


def fcn_resnet50_forward(params, x_nchw):
    N, _, H, W = x_nchw.shape
    x = jnp.transpose(x_nchw, (0, 2, 3, 1)).astype(jnp.bfloat16)  # NHWC bf16

    x = conv2d(x, params["conv1"], stride=2, padding=3, relu=True)
    x = maxpool3x3_s2_p1(x)

    feats = []
    for blocks in params["layers"]:
        for blk in blocks:
            x = bottleneck(x, blk)
        feats.append(x)
    aux_feat, out_feat = feats[2], feats[3]

    # main classifier head (eval mode)
    y = conv2d(out_feat, params["cls1"], padding=1, relu=True)
    # TODO(synk): Dropout(p=0.1) intentionally omitted (eval/inference semantics).
    y = conv2d(y, params["cls2"])                       # (N, h, w, 128) padded logits
    out = upsample_bilinear_to_nchw(y, out_h=H, out_w=W, n_classes=29)

    # aux classifier head
    ya = conv2d(aux_feat, params["aux1"], padding=1, relu=True)
    ya = conv2d(ya, params["aux2"])
    aux = upsample_bilinear_to_nchw(ya, out_h=H, out_w=W, n_classes=21)

    return {"out": out, "aux": aux}


# ---------------------------------------------------------------------------
if __name__ == "__main__":
    key = jax.random.PRNGKey(0)
    x = jax.random.normal(key, (2, 3, 32, 32), jnp.float32)  # NCHW like PyTorch
    params = build_params(seed=0)

    result = fcn_resnet50_forward(params, x)
    jax.block_until_ready(result)

    assert result["out"].shape == (2, 29, 32, 32), result["out"].shape
    assert result["aux"].shape == (2, 21, 32, 32), result["aux"].shape
    assert bool(jnp.isfinite(result["out"]).all())
    assert bool(jnp.isfinite(result["aux"]).all())
    print("KERNEL_OK")
</pallas_src>

<mosaic_0001>
module attributes {stable_mosaic.version = 11 : i64} {
  func.func @_mm_kernel(%arg0: i32, %arg1: i32, %arg2: i32, %arg3: memref<256x256xbf16, #tpu.memory_space<vmem>>, %arg4: memref<256x64xbf16, #tpu.memory_space<vmem>>, %arg5: memref<1x64xf32, #tpu.memory_space<vmem>>, %arg6: memref<1x64xf32, #tpu.memory_space<vmem>>, %arg7: memref<256x64xbf16, #tpu.memory_space<vmem>>, %arg8: memref<256x64xf32, #tpu.memory_space<vmem>>) attributes {dimension_semantics = [#tpu.dimension_semantics<parallel>, #tpu.dimension_semantics<parallel>, #tpu.dimension_semantics<arbitrary>], iteration_bounds = array<i64: 2, 1, 1>, scalar_prefetch = 0 : i64, scratch_operands = 1 : i64, tpu.core_type = #tpu.core_type<tc>, window_params = [{transform_indices = @transform_0, window_bounds = array<i64: 256, 256>}, {transform_indices = @transform_1, window_bounds = array<i64: 256, 64>}, {transform_indices = @transform_2, window_bounds = array<i64: 1, 64>}, {transform_indices = @transform_3, window_bounds = array<i64: 1, 64>}, {transform_indices = @transform_4, window_bounds = array<i64: 256, 64>}]} {
    %c0_i32 = arith.constant 0 : i32
    %0 = arith.cmpi eq, %arg2, %c0_i32 : i32
    %1 = arith.extui %0 : i1 to i32
    %c0_i32_0 = arith.constant 0 : i32
    %2 = arith.cmpi ne, %1, %c0_i32_0 : i32
    scf.if %2 {
      %cst_10 = arith.constant 0.000000e+00 : f32
      %12 = vector.broadcast %cst_10 : f32 to vector<256x64xf32>
      %c0_11 = arith.constant 0 : index
      %c0_12 = arith.constant 0 : index
      %13 = vector.load %arg8[%c0_11, %c0_12] : memref<256x64xf32, #tpu.memory_space<vmem>>, vector<256x64xf32>
      tpu.vector_store %arg8[%c0_11, %c0_12], %12 {strides = array<i32>} : memref<256x64xf32, #tpu.memory_space<vmem>>, vector<256x64xf32>,
    } else {
    }
    %c0 = arith.constant 0 : index
    %c0_1 = arith.constant 0 : index
    %3 = vector.load %arg8[%c0, %c0_1] : memref<256x64xf32, #tpu.memory_space<vmem>>, vector<256x64xf32>
    %c0_2 = arith.constant 0 : index
    %c0_3 = arith.constant 0 : index
    %4 = vector.load %arg3[%c0_2, %c0_3] : memref<256x256xbf16, #tpu.memory_space<vmem>>, vector<256x256xbf16>
    %c0_4 = arith.constant 0 : index
    %c0_5 = arith.constant 0 : index
    %5 = vector.load %arg4[%c0_4, %c0_5] : memref<256x64xbf16, #tpu.memory_space<vmem>>, vector<256x64xbf16>
    %cst = arith.constant dense<0.000000e+00> : vector<256x64xf32>
    %6 = tpu.matmul %4, %5, %cst {dimension_numbers = #tpu.dot_dimension_numbers<[1], [0], [0], [1], [0, 0, 1, 1], [], []>} : vector<256x256xbf16>, vector<256x64xbf16>, vector<256x64xf32> -> vector<256x64xf32>
    %7 = arith.addf %3, %6 : vector<256x64xf32>
    %c0_6 = arith.constant 0 : index
    %c0_7 = arith.constant 0 : index
    %8 = vector.load %arg8[%c0_6, %c0_7] : memref<256x64xf32, #tpu.memory_space<vmem>>, vector<256x64xf32>
    tpu.vector_store %arg8[%c0_6, %c0_7], %7 {strides = array<i32>} : memref<256x64xf32, #tpu.memory_space<vmem>>, vector<256x64xf32>,
    %c0_i32_8 = arith.constant 0 : i32
    %9 = arith.cmpi eq, %arg2, %c0_i32_8 : i32
    %10 = arith.extui %9 : i1 to i32
    %c0_i32_9 = arith.constant 0 : i32
    %11 = arith.cmpi ne, %10, %c0_i32_9 : i32
    scf.if %11 {
      %c0_10 = arith.constant 0 : index
      %c0_11 = arith.constant 0 : index
      %12 = vector.load %arg8[%c0_10, %c0_11] : memref<256x64xf32, #tpu.memory_space<vmem>>, vector<256x64xf32>
      %c0_12 = arith.constant 0 : index
      %c0_13 = arith.constant 0 : index
      %13 = vector.load %arg5[%c0_12, %c0_13] : memref<1x64xf32, #tpu.memory_space<vmem>>, vector<1x64xf32>
      %14 = vector.broadcast %13 : vector<1x64xf32> to vector<256x64xf32>
      %15 = arith.mulf %12, %14 : vector<256x64xf32>
      %c0_14 = arith.constant 0 : index
      %c0_15 = arith.constant 0 : index
      %16 = vector.load %arg6[%c0_14, %c0_15] : memref<1x64xf32, #tpu.memory_space<vmem>>, vector<1x64xf32>
      %17 = vector.broadcast %16 : vector<1x64xf32> to vector<256x64xf32>
      %18 = arith.addf %15, %17 : vector<256x64xf32>
      %cst_16 = arith.constant 0.000000e+00 : f32
      %19 = vector.broadcast %cst_16 : f32 to vector<256x64xf32>
      %20 = arith.maximumf %18, %19 : vector<256x64xf32>
      %21 = arith.truncf %20 : vector<256x64xf32> to vector<256x64xbf16>
      %c0_17 = arith.constant 0 : index
      %c0_18 = arith.constant 0 : index
      %22 = vector.load %arg7[%c0_17, %c0_18] : memref<256x64xbf16, #tpu.memory_space<vmem>>, vector<256x64xbf16>
      tpu.vector_store %arg7[%c0_17, %c0_18], %21 {strides = array<i32>} : memref<256x64xbf16, #tpu.memory_space<vmem>>, vector<256x64xbf16>,
    } else {
    }
    return
  }
  func.func @transform_0(%arg0: i32, %arg1: i32, %arg2: i32) -> (i32, i32) {
    %c0_i32 = arith.constant 0 : i32
    return %arg0, %arg2 : i32, i32
  }
  func.func @transform_1(%arg0: i32, %arg1: i32, %arg2: i32) -> (i32, i32) {
    %c0_i32 = arith.constant 0 : i32
    return %arg2, %arg1 : i32, i32
  }
  func.func @transform_2(%arg0: i32, %arg1: i32, %arg2: i32) -> (i32, i32) {
    %c0_i32 = arith.constant 0 : i32
    %c0_i32_0 = arith.constant 0 : i32
    return %c0_i32, %arg1 : i32, i32
  }
  func.func @transform_3(%arg0: i32, %arg1: i32, %arg2: i32) -> (i32, i32) {
    %c0_i32 = arith.constant 0 : i32
    %c0_i32_0 = arith.constant 0 : i32
    return %c0_i32, %arg1 : i32, i32
  }
  func.func @transform_4(%arg0: i32, %arg1: i32, %arg2: i32) -> (i32, i32) {
    %c0_i32 = arith.constant 0 : i32
    return %arg0, %arg1 : i32, i32
  }
}

</mosaic_0001>

<bundles_post_ra>
// kernel: matmul_fused.1
= control target key start
LH: loop header
LB: loop body
LE: loop exit
PB: predicated region body
PF: predicated region fallthrough
CT: control target
= control target key end

     0   :  { %s1753_s15 = smov 0   ;;  %s1755_s16 = smov 0   ;;  %s2076_s0 = inlined_call_operand.vmem [shape: bf16[512,256], index: 0, kind: input, shape index: {}]   ;;  %s2077_s1 = inlined_call_operand.vmem [shape: bf16[256,64], index: 1, kind: input, shape index: {}]   ;;  %s2078_s2 = inlined_call_operand.vmem [shape: f32[1,64], index: 2, kind: input, shape index: {}]   ;;  %s2079_s3 = inlined_call_operand.vmem [shape: f32[1,64], index: 3, kind: input, shape index: {}]   ;;  %s2080_s4 = inlined_call_operand.vmem [shape: bf16[512,64], index: 4, kind: output, shape index: {}]  }
   0x1   :  { %s1757_s17 = smov 0  }
   0x2 LB: > { %s33_s18 = sadd.s32 1, %s1721_s16  ;;  %p1363_p0 = scmp.ge.s32.totalorder %s1725_s17, 1  ;;  %s1725_s17 = sphi %s1757_s17, %s14_s17   ;;  %s1721_s16 = sphi %s1755_s16, %s2082_s16   ;;  %s1717_s15 = sphi %s1753_s15, %s2081_s15  }
   0x3   : > { %p35_p1 = scmp.ge.s32.totalorder %s33_s18, 2  ;;  %p224_p2 = scmp.lt.s32.totalorder %s1725_s17, 3 }
   0x5   : > { %s2084_s18 = smov (%p35_p1, %s33_s18), 0  ;;  %p225_p3 = pnand %p1363_p0, %p224_p2 }
   0x6   : > { %v1639_v0 = vld [vmem:[%s2077_s1 + $0x40] sm:$0xff] (!%p225_p3)   ;;  %s1364_s21 = sshll.u32 (!%p225_p3), %s1717_s15, 5  ;;  %v1641_v2 = vld [vmem:[%s2077_s1 + $0x48] sm:$0xff] (!%p225_p3)   ;;  %v1643_v4 = vld [vmem:[%s2077_s1 + $0x50] sm:$0xff] (!%p225_p3)   ;;  %vm313_vm0 = vcmask (!%p225_p3), 523264   ;;  %v1727_v48 = vmov (!%p225_p3), 0.0  }
   0x7   : > { %228 = sbr.rel (%p225_p3) target bundleno = 333 (0x14d), region = 36  ;;  %v1640_v1 = vld [vmem:[%s2077_s1] sm:$0xff] (!%p225_p3)   ;;  %1486 = vmatprep.subr.bf16.mxu0 (!%p225_p3), %v1639_v0  ;;  %1598 = vmatprep.subr.bf16.mxu1 (!%p225_p3), %v1639_v0  ;;  %v1642_v3 = vld [vmem:[%s2077_s1 + $0x8] sm:$0xff] (!%p225_p3)   ;;  %p274_p4 = scmp.lt.s32.totalorder (!%p225_p3), %s1364_s21, 63  ;;  %v1644_v5 = vld [vmem:[%s2077_s1 + $0x10] sm:$0xff] (!%p225_p3)   ;;  %314 = vst.msk [vmem:[#allocation2] sm:$0xff] (!%p225_p3), %vm313_vm0, %v1727_v48 }
   0x8   : > { %1487 = vmatpush3.bf16.msra.mxu0 (!%p225_p3), %v1640_v1  ;;  %1606 = vmatpush3.bf16.msra.mxu1 (!%p225_p3), %v1640_v1  ;;  %v1645_v6 = vld [vmem:[%s2077_s1 + $0x58] sm:$0xff] (!%p225_p3)   ;;  %v1647_v8 = vld [vmem:[%s2077_s1 + $0x60] sm:$0xff] (!%p225_p3)   ;;  %v1649_v10 = vld [vmem:[%s2077_s1 + $0x68] sm:$0xff] (!%p225_p3)   ;;  %315 = vst.msk [vmem:[#allocation2 + $0x8] sm:$0xff] (!%p225_p3), %vm313_vm0, %v1727_v48  ;;  %vm1197_vm1 = vcmask (!%p225_p3), 519168  }
   0x9   : > { %1488 = vmatprep.subr.bf16.mxu0 (!%p225_p3), %v1641_v2  ;;  %1599 = vmatprep.subr.bf16.mxu1 (!%p225_p3), %v1641_v2  ;;  %v1646_v7 = vld [vmem:[%s2077_s1 + $0x18] sm:$0xff] (!%p225_p3)   ;;  %v1648_v9 = vld [vmem:[%s2077_s1 + $0x20] sm:$0xff] (!%p225_p3)   ;;  %v1650_v13 = vld [vmem:[%s2077_s1 + $0x28] sm:$0xff] (!%p225_p3)   ;;  %316 = vst.msk [vmem:[#allocation2 + $0x10] sm:$0xff] (!%p225_p3), %vm313_vm0, %v1727_v48 }
   0xa   : > { %v1651_v14 = vld [vmem:[%s2077_s1 + $0x70] sm:$0xff] (!%p225_p3)   ;;  %v1653_v16 = vld [vmem:[%s2077_s1 + $0x78] sm:$0xff] (!%p225_p3)   ;;  %317 = vst.msk [vmem:[#allocation2 + $0x18] sm:$0xff] (!%p225_p3), %vm313_vm0, %v1727_v48  ;;  %318 = vst.msk [vmem:[#allocation2 + $0x20] sm:$0xff] (!%p225_p3), %vm313_vm0, %v1727_v48 }
   0xb   : > { %v1652_v15 = vld [vmem:[%s2077_s1 + $0x30] sm:$0xff] (!%p225_p3)   ;;  %v1654_v17 = vld [vmem:[%s2077_s1 + $0x38] sm:$0xff] (!%p225_p3)   ;;  %319 = vst.msk [vmem:[#allocation2 + $0x28] sm:$0xff] (!%p225_p3), %vm313_vm0, %v1727_v48  ;;  %320 = vst.msk [vmem:[#allocation2 + $0x30] sm:$0xff] (!%p225_p3), %vm313_vm0, %v1727_v48 }
   0xc   : > { %1489 = vmatpush3.bf16.msra.mxu0 (!%p225_p3), %v1642_v3  ;;  %1607 = vmatpush3.bf16.msra.mxu1 (!%p225_p3), %v1642_v3  ;;  %321 = vst.msk [vmem:[#allocation2 + $0x38] sm:$0xff] (!%p225_p3), %vm313_vm0, %v1727_v48  ;;  %322 = vst.msk [vmem:[#allocation2 + $0x40] sm:$0xff] (!%p225_p3), %vm313_vm0, %v1727_v48 }
   0xd   : > { %1490 = vmatprep.subr.bf16.mxu0 (!%p225_p3), %v1643_v4  ;;  %1600 = vmatprep.subr.bf16.mxu1 (!%p225_p3), %v1643_v4  ;;  %323 = vst.msk [vmem:[#allocation2 + $0x48] sm:$0xff] (!%p225_p3), %vm313_vm0, %v1727_v48  ;;  %324 = vst.msk [vmem:[#allocation2 + $0x50] sm:$0xff] (!%p225_p3), %vm313_vm0, %v1727_v48 }
   0xe   : > { %s2086_s21 = smov (!%p274_p4, %s1364_s21), 63  ;;  %325 = vst.msk [vmem:[#allocation2 + $0x58] sm:$0xff] %vm313_vm0, %v1727_v48  ;;  %326 = vst.msk [vmem:[#allocation2 + $0x60] sm:$0xff] %vm313_vm0, %v1727_v48  ;;  %v346_v51 = vld [vmem:[#allocation2] sm:$0xff] }
   0xf   : > { %s1453_s10 = sshll.u32 %s2086_s21, 3  ;;  %327 = vst.msk [vmem:[#allocation2 + $0x68] sm:$0xff] %vm313_vm0, %v1727_v48  ;;  %328 = vst.msk [vmem:[#allocation2 + $0x70] sm:$0xff] %vm313_vm0, %v1727_v48  ;;  %v347_v59 = vld [vmem:[#allocation2 + $0x8] sm:$0xff]  ;;  %s1368_s12 = sshll.u32 %s2086_s21, 2 }
  0x10   : > { %1491 = vmatpush3.bf16.msra.mxu0 %v1644_v5  ;;  %1608 = vmatpush3.bf16.msra.mxu1 %v1644_v5  ;;  %s1804_s15 = scalar_lea.vmem %s2076_s0, %s1453_s10  ;;  %329 = vst.msk [vmem:[#allocation2 + $0x78] sm:$0xff] %vm313_vm0, %v1727_v48  ;;  %330 = vst.msk [vmem:[#allocation2 + $0x80] sm:$0xff] %vm313_vm0, %v1727_v48  ;;  %s1921_s14 = scalar_lea.vmem %s2080_s4, %s1368_s12 }
  0x11   : > { %1492 = vmatprep.subr.bf16.mxu0 %v1645_v6  ;;  %1601 = vmatprep.subr.bf16.mxu1 %v1645_v6  ;;  %v1657_v11 = vld [vmem:[%s1804_s15 + $0x4] ss:$8 sps:$4 sm:$0xff]   ;;  %v1655_v18 = vld [vmem:[%s1804_s15] ss:$8 sps:$4 sm:$0xff]   ;;  %v1661_v20 = vld [vmem:[%s1804_s15 + $0x14] ss:$8 sps:$4 sm:$0xff]  }
  0x12   : > { %v1660_v12 = vld [vmem:[%s1804_s15 + $0x84] ss:$8 sps:$4 sm:$0xff]   ;;  %730 = vmatprep.mubr.bf16.mxu0 %v1657_v11  ;;  %v1658_v19 = vld [vmem:[%s1804_s15 + $0x80] ss:$8 sps:$4 sm:$0xff]   ;;  %v1663_v21 = vld [vmem:[%s1804_s15 + $0x94] ss:$8 sps:$4 sm:$0xff]  }
  0x13   : > { %794 = vmatprep.mubr.bf16.mxu1 %v1660_v12  ;;  %v1665_v22 = vld [vmem:[%s1804_s15 + $0x10] ss:$8 sps:$4 sm:$0xff]   ;;  %v1667_v24 = vld [vmem:[%s1804_s15 + $0x24] ss:$8 sps:$4 sm:$0xff]   ;;  %v1671_v26 = vld [vmem:[%s1804_s15 + $0x20] ss:$8 sps:$4 sm:$0xff]  }
  0x14   : > { %1493 = vmatpush3.bf16.msra.mxu0 %v1646_v7  ;;  %1609 = vmatpush3.bf16.msra.mxu1 %v1646_v7  ;;  %v1666_v23 = vld [vmem:[%s1804_s15 + $0x90] ss:$8 sps:$4 sm:$0xff]   ;;  %v1669_v25 = vld [vmem:[%s1804_s15 + $0xa4] ss:$8 sps:$4 sm:$0xff]   ;;  %v1672_v27 = vld [vmem:[%s1804_s15 + $0xa0] ss:$8 sps:$4 sm:$0xff]  }
  0x15   : > { %1494 = vmatprep.subr.bf16.mxu0 %v1647_v8  ;;  %1602 = vmatprep.subr.bf16.mxu1 %v1647_v8  ;;  %v1673_v28 = vld [vmem:[%s1804_s15 + $0x34] ss:$8 sps:$4 sm:$0xff]   ;;  %v1677_v30 = vld [vmem:[%s1804_s15 + $0x30] ss:$8 sps:$4 sm:$0xff]   ;;  %v1679_v32 = vld [vmem:[%s1804_s15 + $0x44] ss:$8 sps:$4 sm:$0xff]  }
  0x16   : > { %v1675_v29 = vld [vmem:[%s1804_s15 + $0xb4] ss:$8 sps:$4 sm:$0xff]   ;;  %v1678_v31 = vld [vmem:[%s1804_s15 + $0xb0] ss:$8 sps:$4 sm:$0xff]   ;;  %v1681_v33 = vld [vmem:[%s1804_s15 + $0xc4] ss:$8 sps:$4 sm:$0xff]  }
  0x17   : > { %v1683_v34 = vld [vmem:[%s1804_s15 + $0x40] ss:$8 sps:$4 sm:$0xff]   ;;  %v1685_v36 = vld [vmem:[%s1804_s15 + $0x54] ss:$8 sps:$4 sm:$0xff]   ;;  %v1689_v38 = vld [vmem:[%s1804_s15 + $0x50] ss:$8 sps:$4 sm:$0xff]  }
  0x18   : > { %1495 = vmatpush3.bf16.msra.mxu0 %v1648_v9  ;;  %1610 = vmatpush3.bf16.msra.mxu1 %v1648_v9  ;;  %v1684_v35 = vld [vmem:[%s1804_s15 + $0xc0] ss:$8 sps:$4 sm:$0xff]   ;;  %v1687_v37 = vld [vmem:[%s1804_s15 + $0xd4] ss:$8 sps:$4 sm:$0xff]   ;;  %v1690_v39 = vld [vmem:[%s1804_s15 + $0xd0] ss:$8 sps:$4 sm:$0xff]  }
  0x19   : > { %1496 = vmatprep.subr.bf16.mxu0 %v1649_v10  ;;  %1603 = vmatprep.subr.bf16.mxu1 %v1649_v10  ;;  %v1691_v40 = vld [vmem:[%s1804_s15 + $0x64] ss:$8 sps:$4 sm:$0xff]   ;;  %v1695_v42 = vld [vmem:[%s1804_s15 + $0x60] ss:$8 sps:$4 sm:$0xff]   ;;  %v1697_v44 = vld [vmem:[%s1804_s15 + $0x74] ss:$8 sps:$4 sm:$0xff]  }
  0x1a   : > { %v1693_v41 = vld [vmem:[%s1804_s15 + $0xe4] ss:$8 sps:$4 sm:$0xff]   ;;  %v1696_v43 = vld [vmem:[%s1804_s15 + $0xe0] ss:$8 sps:$4 sm:$0xff]   ;;  %v1699_v45 = vld [vmem:[%s1804_s15 + $0xf4] ss:$8 sps:$4 sm:$0xff]  }
  0x1b   : > { %v1701_v46 = vld [vmem:[%s1804_s15 + $0x70] ss:$8 sps:$4 sm:$0xff]   ;;  %331 = vst.msk [vmem:[#allocation2 + $0x88] sm:$0xff] %vm313_vm0, %v1727_v48  ;;  %332 = vst.msk [vmem:[#allocation2 + $0x90] sm:$0xff] %vm313_vm0, %v1727_v48  ;;  %v362_v53 = vld [vmem:[#allocation2 + $0x80] sm:$0xff] }
  0x1c   : > { %1497 = vmatpush3.bf16.msra.mxu0 %v1650_v13  ;;  %1611 = vmatpush3.bf16.msra.mxu1 %v1650_v13  ;;  %v1702_v47 = vld [vmem:[%s1804_s15 + $0xf0] ss:$8 sps:$4 sm:$0xff]   ;;  %333 = vst.msk [vmem:[#allocation2 + $0x98] sm:$0xff] %vm313_vm0, %v1727_v48  ;;  %334 = vst.msk [vmem:[#allocation2 + $0xa0] sm:$0xff] %vm313_vm0, %v1727_v48 }
  0x1d   : > { %1498 = vmatprep.subr.bf16.mxu0 %v1651_v14  ;;  %1604 = vmatprep.subr.bf16.mxu1 %v1651_v14  ;;  %335 = vst.msk [vmem:[#allocation2 + $0xa8] sm:$0xff] %vm313_vm0, %v1727_v48  ;;  %336 = vst.msk [vmem:[#allocation2 + $0xb0] sm:$0xff] %vm313_vm0, %v1727_v48  ;;  %v348_v7 = vld [vmem:[#allocation2 + $0x10] sm:$0xff] }
  0x1e   : > { %337 = vst.msk [vmem:[#allocation2 + $0xb8] sm:$0xff] %vm313_vm0, %v1727_v48  ;;  %338 = vst.msk [vmem:[#allocation2 + $0xc0] sm:$0xff] %vm313_vm0, %v1727_v48 }
  0x1f   : > { %339 = vst.msk [vmem:[#allocation2 + $0xc8] sm:$0xff] %vm313_vm0, %v1727_v48  ;;  %340 = vst.msk [vmem:[#allocation2 + $0xd0] sm:$0xff] %vm313_vm0, %v1727_v48 }
  0x20   : > { %1499 = vmatpush3.bf16.msra.mxu0 %v1652_v15  ;;  %1612 = vmatpush3.bf16.msra.mxu1 %v1652_v15  ;;  %341 = vst.msk [vmem:[#allocation2 + $0xd8] sm:$0xff] %vm313_vm0, %v1727_v48  ;;  %342 = vst.msk [vmem:[#allocation2 + $0xe0] sm:$0xff] %vm313_vm0, %v1727_v48  ;;  %v1898_v15 = vld [vmem:[%s2078_s2] ss:$0 sm:$0xff] }
  0x21   : > { %1500 = vmatprep.subr.bf16.mxu0 %v1653_v16  ;;  %1605 = vmatprep.subr.bf16.mxu1 %v1653_v16  ;;  %343 = vst.msk [vmem:[#allocation2 + $0xe8] sm:$0xff] %vm313_vm0, %v1727_v48  ;;  %344 = vst.msk [vmem:[#allocation2 + $0xf0] sm:$0xff] %vm313_vm0, %v1727_v48  ;;  %v349_v16 = vld [vmem:[#allocation2 + $0x18] sm:$0xff] }
  0x22   : > { %345 = vst.msk [vmem:[#allocation2 + $0xf8] sm:$0xff] %vm313_vm0, %v1727_v48  ;;  %v363_v61 = vld [vmem:[#allocation2 + $0x88] sm:$0xff]  ;;  %v364_v9 = vld [vmem:[#allocation2 + $0x90] sm:$0xff] }
  0x24   : > { %1501 = vmatpush3.bf16.msra.mxu0 %v1654_v17  ;;  %1613 = vmatpush3.bf16.msra.mxu1 %v1654_v17 }
  0x27   : > { %731 = vmatmul.mubr.bf16.vlgmr.msra.gmra.mrb[0].mxu0 %v1655_v18  ;;  %795 = vmatmul.mubr.bf16.vlgmr.msra.gmra.mrb[0].mxu1 %v1658_v19  ;;  %v365_v18 = vld [vmem:[#allocation2 + $0x98] sm:$0xff] }
  0x28   : > { %738 = vmatprep.mubr.bf16.mxu0 %v1661_v20  ;;  %802 = vmatprep.mubr.bf16.mxu1 %v1663_v21 }
  0x2f   : > { %739 = vmatmul.mubr.bf16.gmra.mrb[4].mxu0 %v1665_v22  ;;  %803 = vmatmul.mubr.bf16.gmra.mrb[4].mxu1 %v1666_v23 }
  0x30   : > { %746 = vmatprep.mubr.bf16.mxu0 %v1667_v24  ;;  %810 = vmatprep.mubr.bf16.mxu1 %v1669_v25  ;;  %v1903_v25 = vld [vmem:[%s2079_s3] ss:$0 sm:$0xff] }
  0x37   : > { %747 = vmatmul.mubr.bf16.gmra.mrb[8].mxu0 %v1671_v26  ;;  %811 = vmatmul.mubr.bf16.gmra.mrb[8].mxu1 %v1672_v27 }
  0x38   : > { %754 = vmatprep.mubr.bf16.mxu0 %v1673_v28  ;;  %818 = vmatprep.mubr.bf16.mxu1 %v1675_v29 }
  0x3f   : > { %755 = vmatmul.mubr.bf16.gmra.mrb[12].mxu0 %v1677_v30  ;;  %819 = vmatmul.mubr.bf16.gmra.mrb[12].mxu1 %v1678_v31 }
  0x40   : > { %762 = vmatprep.mubr.bf16.mxu0 %v1679_v32  ;;  %826 = vmatprep.mubr.bf16.mxu1 %v1681_v33 }
  0x47   : > { %763 = vmatmul.mubr.bf16.gmra.mrb[16].mxu0 %v1683_v34  ;;  %827 = vmatmul.mubr.bf16.gmra.mrb[16].mxu1 %v1684_v35 }
  0x48   : > { %770 = vmatprep.mubr.bf16.mxu0 %v1685_v36  ;;  %834 = vmatprep.mubr.bf16.mxu1 %v1687_v37 }
  0x4f   : > { %771 = vmatmul.mubr.bf16.gmra.mrb[20].mxu0 %v1689_v38  ;;  %835 = vmatmul.mubr.bf16.gmra.mrb[20].mxu1 %v1690_v39 }
  0x50   : > { %778 = vmatprep.mubr.bf16.mxu0 %v1691_v40  ;;  %842 = vmatprep.mubr.bf16.mxu1 %v1693_v41 }
  0x57   : > { %779 = vmatmul.mubr.bf16.gmra.mrb[24].mxu0 %v1695_v42  ;;  %843 = vmatmul.mubr.bf16.gmra.mrb[24].mxu1 %v1696_v43 }
  0x58   : > { %786 = vmatprep.mubr.bf16.mxu0 %v1697_v44  ;;  %850 = vmatprep.mubr.bf16.mxu1 %v1699_v45  ;;  %v350_v45 = vld [vmem:[#allocation2 + $0x20] sm:$0xff] }
  0x5f   : > { %787 = vmatmul.mubr.bf16.gmra.mrb[28].mxu0 %v1701_v46  ;;  %851 = vmatmul.mubr.bf16.gmra.mrb[28].mxu1 %v1702_v47  ;;  %v366_v46 = vld [vmem:[#allocation2 + $0xa0] sm:$0xff] }
  0xfa   : > { %v1502_v49 = vpop.f32.mrb[0].mxu0  ;;  %v1550_v50 = vpop.f32.mrb[0].mxu1 }
  0xfb   : > { %v1503_v52 = vpop.f32.mrb[1].mxu0  ;;  %v1551_v54 = vpop.f32.mrb[1].mxu1 }
  0xfc   : > { %v1504_v55 = vadd.f32 %v1503_v52, %v1502_v49  ;;  %v1552_v56 = vadd.f32 %v1551_v54, %v1550_v50  ;;  %v1505_v57 = vpop.f32.mrb[2].mxu0  ;;  %v1553_v58 = vpop.f32.mrb[2].mxu1 }
  0xfd   : > { %v1506_v60 = vpop.f32.mrb[3].mxu0  ;;  %v1554_v62 = vpop.f32.mrb[3].mxu1 }
  0xfe   : > { %v859_v63 = vadd.f32 %v1504_v55, %v346_v51  ;;  %v875_v0 = vadd.f32 %v1552_v56, %v362_v53  ;;  %v1507_v1 = vadd.f32 %v1506_v60, %v1505_v57  ;;  %v1555_v2 = vadd.f32 %v1554_v62, %v1553_v58  ;;  %v351_v57 = vld [vmem:[#allocation2 + $0x28] sm:$0xff] }
  0xff   : > { %v367_v58 = vld [vmem:[#allocation2 + $0xa8] sm:$0xff] }
 0x100   : > { %892 = vst.msk [vmem:[#allocation2] sm:$0xff] %vm313_vm0, %v859_v63  ;;  %908 = vst.msk [vmem:[#allocation2 + $0x80] sm:$0xff] %vm313_vm0, %v875_v0  ;;  %v860_v3 = vadd.f32 %v1507_v1, %v347_v59  ;;  %v876_v4 = vadd.f32 %v1555_v2, %v363_v61 }
 0x102   : > { %893 = vst.msk [vmem:[#allocation2 + $0x8] sm:$0xff] %vm313_vm0, %v860_v3  ;;  %909 = vst.msk [vmem:[#allocation2 + $0x88] sm:$0xff] %vm313_vm0, %v876_v4  ;;  %v1508_v5 = vpop.f32.mrb[4].mxu0  ;;  %v1556_v6 = vpop.f32.mrb[4].mxu1 }
 0x103   : > { %v1509_v8 = vpop.f32.mrb[5].mxu0  ;;  %v1557_v10 = vpop.f32.mrb[5].mxu1 }
 0x104   : > { %v1510_v11 = vadd.f32 %v1509_v8, %v1508_v5  ;;  %v1558_v12 = vadd.f32 %v1557_v10, %v1556_v6  ;;  %v1511_v13 = vpop.f32.mrb[6].mxu0  ;;  %v1559_v14 = vpop.f32.mrb[6].mxu1 }
 0x105   : > { %v1512_v17 = vpop.f32.mrb[7].mxu0  ;;  %v1560_v19 = vpop.f32.mrb[7].mxu1 }
 0x106   : > { %v861_v20 = vadd.f32 %v1510_v11, %v348_v7  ;;  %v877_v21 = vadd.f32 %v1558_v12, %v364_v9  ;;  %v1513_v22 = vadd.f32 %v1512_v17, %v1511_v13  ;;  %v1561_v23 = vadd.f32 %v1560_v19, %v1559_v14 }
 0x107   : > { %v927_v24 = vld [vmem:[#allocation2] sm:$0xff] }
 0x108   : > { %v943_v26 = vld [vmem:[#allocation2 + $0x80] sm:$0xff]  ;;  %v966_v27 = vmul.f32 %v1898_v15, %v927_v24  ;;  %894 = vst.msk [vmem:[#allocation2 + $0x10] sm:$0xff] %vm313_vm0, %v861_v20  ;;  %910 = vst.msk [vmem:[#allocation2 + $0x90] sm:$0xff] %vm313_vm0, %v877_v21  ;;  %v862_v29 = vadd.f32 %v1513_v22, %v349_v16  ;;  %v878_v30 = vadd.f32 %v1561_v23, %v365_v18  ;;  %v352_v22 = vld [vmem:[#allocation2 + $0x30] sm:$0xff] }
 0x109   : > { %v982_v28 = vmul.f32 %v1898_v15, %v943_v26  ;;  %v928_v31 = vld [vmem:[#allocation2 + $0x8] sm:$0xff]  ;;  %v368_v23 = vld [vmem:[#allocation2 + $0xb0] sm:$0xff] }
 0x10a   : > { %v944_v32 = vld [vmem:[#allocation2 + $0x88] sm:$0xff]  ;;  %v1005_v33 = vadd.f32 %v1903_v25, %v966_v27  ;;  %v967_v35 = vmul.f32 %v1898_v15, %v928_v31  ;;  %895 = vst.msk [vmem:[#allocation2 + $0x18] sm:$0xff] %vm313_vm0, %v862_v29  ;;  %911 = vst.msk [vmem:[#allocation2 + $0x98] sm:$0xff] %vm313_vm0, %v878_v30  ;;  %v1514_v37 = vpop.f32.mrb[8].mxu0  ;;  %v1562_v38 = vpop.f32.mrb[8].mxu1 }
 0x10b   : > { %v1021_v34 = vadd.f32 %v1903_v25, %v982_v28  ;;  %v983_v36 = vmul.f32 %v1898_v15, %v944_v32  ;;  %v1515_v39 = vpop.f32.mrb[9].mxu0  ;;  %v1563_v40 = vpop.f32.mrb[9].mxu1 }
 0x10c   : > { %v1037_v41 = vmax.f32 %v1005_v33, 0.0  ;;  %v1006_v43 = vadd.f32 %v1903_v25, %v967_v35  ;;  %v1517_v47 = vpop.f32.mrb[10].mxu0  ;;  %v1565_v48 = vpop.f32.mrb[10].mxu1  ;;  %v1516_v49 = vadd.f32 %v1515_v39, %v1514_v37  ;;  %v1564_v50 = vadd.f32 %v1563_v40, %v1562_v38  ;;  %v353_v35 = vld [vmem:[#allocation2 + $0x38] sm:$0xff] }
 0x10d   : > { %v1053_v42 = vmax.f32 %v1021_v34, 0.0  ;;  %v1022_v44 = vadd.f32 %v1903_v25, %v983_v36  ;;  %v1518_v51 = vpop.f32.mrb[11].mxu0  ;;  %v1566_v52 = vpop.f32.mrb[11].mxu1  ;;  %v369_v36 = vld [vmem:[#allocation2 + $0xb8] sm:$0xff] }
 0x10e   : > { %v1454_v53 = vpack.c.bf16 %v1037_v41, %v1037_v41  ;;  %v1038_v55 = vmax.f32 %v1006_v43, 0.0  ;;  %v863_v61 = vadd.f32 %v1516_v49, %v350_v45  ;;  %v879_v62 = vadd.f32 %v1564_v50, %v366_v46 }
 0x10f   : > { %v1470_v54 = vpack.c.bf16 %v1053_v42, %v1053_v42  ;;  %v1054_v56 = vmax.f32 %v1022_v44, 0.0  ;;  %v929_v59 = vld [vmem:[#allocation2 + $0x10] sm:$0xff]  ;;  %v1519_v63 = vadd.f32 %v1518_v51, %v1517_v47  ;;  %v1567_v0 = vadd.f32 %v1566_v52, %v1565_v48 }
 0x110   : > { %v945_v60 = vld [vmem:[#allocation2 + $0x90] sm:$0xff]  ;;  %1198 = vst.msk [vmem:[%s1921_s14] sm:$0xf] %vm1197_vm1, %v1454_v53  ;;  %v1455_v1 = vpack.c.bf16 %v1038_v55, %v1038_v55  ;;  %v968_v3 = vmul.f32 %v1898_v15, %v929_v59  ;;  %v370_v59 = vld [vmem:[#allocation2 + $0xc0] sm:$0xff] }
 0x111   : > { %1214 = vst.msk [vmem:[%s1921_s14 + $0x40] sm:$0xf] %vm1197_vm1, %v1470_v54  ;;  %v1471_v2 = vpack.c.bf16 %v1054_v56, %v1054_v56  ;;  %v984_v4 = vmul.f32 %v1898_v15, %v945_v60  ;;  %v930_v5 = vld [vmem:[#allocation2 + $0x18] sm:$0xff]  ;;  %v864_v7 = vadd.f32 %v1519_v63, %v351_v57  ;;  %v880_v8 = vadd.f32 %v1567_v0, %v367_v58  ;;  %v354_v57 = vld [vmem:[#allocation2 + $0x40] sm:$0xff] }
 0x112   : > { %v946_v6 = vld [vmem:[#allocation2 + $0x98] sm:$0xff]  ;;  %896 = vst.msk [vmem:[#allocation2 + $0x20] sm:$0xff] %vm313_vm0, %v863_v61  ;;  %912 = vst.msk [vmem:[#allocation2 + $0xa0] sm:$0xff] %vm313_vm0, %v879_v62  ;;  %v1007_v9 = vadd.f32 %v1903_v25, %v968_v3  ;;  %v969_v11 = vmul.f32 %v1898_v15, %v930_v5  ;;  %v1520_v13 = vpop.f32.mrb[12].mxu0  ;;  %v1568_v14 = vpop.f32.mrb[12].mxu1  ;;  %v355_v5 = vld [vmem:[#allocation2 + $0x48] sm:$0xff] }
 0x113   : > { %1199 = vst.msk [vmem:[%s1921_s14 + $0x4] sm:$0xf] %vm1197_vm1, %v1455_v1  ;;  %1215 = vst.msk [vmem:[%s1921_s14 + $0x44] sm:$0xf] %vm1197_vm1, %v1471_v2  ;;  %v1023_v10 = vadd.f32 %v1903_v25, %v984_v4  ;;  %v985_v12 = vmul.f32 %v1898_v15, %v946_v6  ;;  %v1521_v16 = vpop.f32.mrb[13].mxu0  ;;  %v1569_v17 = vpop.f32.mrb[13].mxu1 }
 0x114   : > { %897 = vst.msk [vmem:[#allocation2 + $0x28] sm:$0xff] %vm313_vm0, %v864_v7  ;;  %913 = vst.msk [vmem:[#allocation2 + $0xa8] sm:$0xff] %vm313_vm0, %v880_v8  ;;  %v1039_v18 = vmax.f32 %v1007_v9, 0.0  ;;  %v1008_v20 = vadd.f32 %v1903_v25, %v969_v11  ;;  %v1523_v24 = vpop.f32.mrb[14].mxu0  ;;  %v1571_v26 = vpop.f32.mrb[14].mxu1  ;;  %v1522_v27 = vadd.f32 %v1521_v16, %v1520_v13  ;;  %v1570_v28 = vadd.f32 %v1569_v17, %v1568_v14  ;;  %v371_v7 = vld [vmem:[#allocation2 + $0xc8] sm:$0xff] }
 0x115   : > { %v1055_v19 = vmax.f32 %v1023_v10, 0.0  ;;  %v1024_v21 = vadd.f32 %v1903_v25, %v985_v12  ;;  %v1524_v29 = vpop.f32.mrb[15].mxu0  ;;  %v1572_v30 = vpop.f32.mrb[15].mxu1 }
 0x116   : > { %v1456_v31 = vpack.c.bf16 %v1039_v18, %v1039_v18  ;;  %v1040_v33 = vmax.f32 %v1008_v20, 0.0  ;;  %v865_v37 = vadd.f32 %v1522_v27, %v352_v22  ;;  %v881_v38 = vadd.f32 %v1570_v28, %v368_v23 }
 0x117   : > { %v1472_v32 = vpack.c.bf16 %v1055_v19, %v1055_v19  ;;  %v1056_v34 = vmax.f32 %v1024_v21, 0.0  ;;  %v1525_v39 = vadd.f32 %v1524_v29, %v1523_v24  ;;  %v1573_v40 = vadd.f32 %v1572_v30, %v1571_v26 }
 0x118   : > { %1200 = vst.msk [vmem:[%s1921_s14 + $0x8] sm:$0xf] %vm1197_vm1, %v1456_v31  ;;  %v1457_v41 = vpack.c.bf16 %v1040_v33, %v1040_v33 }
 0x119   : > { %1216 = vst.msk [vmem:[%s1921_s14 + $0x48] sm:$0xf] %vm1197_vm1, %v1472_v32  ;;  %v1473_v42 = vpack.c.bf16 %v1056_v34, %v1056_v34  ;;  %v931_v43 = vld [vmem:[#allocation2 + $0x20] sm:$0xff]  ;;  %v866_v47 = vadd.f32 %v1525_v39, %v353_v35  ;;  %v882_v48 = vadd.f32 %v1573_v40, %v369_v36  ;;  %v356_v35 = vld [vmem:[#allocation2 + $0x50] sm:$0xff] }
 0x11a   : > { %v947_v44 = vld [vmem:[#allocation2 + $0xa0] sm:$0xff]  ;;  %v970_v45 = vmul.f32 %v1898_v15, %v931_v43  ;;  %898 = vst.msk [vmem:[#allocation2 + $0x30] sm:$0xff] %vm313_vm0, %v865_v37  ;;  %914 = vst.msk [vmem:[#allocation2 + $0xb0] sm:$0xff] %vm313_vm0, %v881_v38  ;;  %v1526_v51 = vpop.f32.mrb[16].mxu0  ;;  %v1574_v52 = vpop.f32.mrb[16].mxu1  ;;  %v372_v37 = vld [vmem:[#allocation2 + $0xd0] sm:$0xff] }
 0x11b   : > { %v986_v46 = vmul.f32 %v1898_v15, %v947_v44  ;;  %1201 = vst.msk [vmem:[%s1921_s14 + $0xc] sm:$0xf] %vm1197_vm1, %v1457_v41  ;;  %1217 = vst.msk [vmem:[%s1921_s14 + $0x4c] sm:$0xf] %vm1197_vm1, %v1473_v42  ;;  %v932_v49 = vld [vmem:[#allocation2 + $0x28] sm:$0xff]  ;;  %v1527_v58 = vpop.f32.mrb[17].mxu0 }
 0x11c   : > { %v948_v50 = vld [vmem:[#allocation2 + $0xa8] sm:$0xff]  ;;  %v1009_v53 = vadd.f32 %v1903_v25, %v970_v45  ;;  %v971_v55 = vmul.f32 %v1898_v15, %v932_v49  ;;  %899 = vst.msk [vmem:[#allocation2 + $0x38] sm:$0xff] %vm313_vm0, %v866_v47  ;;  %915 = vst.msk [vmem:[#allocation2 + $0xb8] sm:$0xff] %vm313_vm0, %v882_v48  ;;  %v1575_v60 = vpop.f32.mrb[17].mxu1  ;;  %v1528_v61 = vadd.f32 %v1527_v58, %v1526_v51  ;;  %v1529_v63 = vpop.f32.mrb[18].mxu0  ;;  %v357_v47 = vld [vmem:[#allocation2 + $0x58] sm:$0xff] }
 0x11d   : > { %v1025_v54 = vadd.f32 %v1903_v25, %v986_v46  ;;  %v987_v56 = vmul.f32 %v1898_v15, %v948_v50  ;;  %v1576_v62 = vadd.f32 %v1575_v60, %v1574_v52  ;;  %v1577_v0 = vpop.f32.mrb[18].mxu1  ;;  %v1530_v6 = vpop.f32.mrb[19].mxu0  ;;  %v373_v49 = vld [vmem:[#allocation2 + $0xd8] sm:$0xff] }
 0x11e   : > { %v1041_v1 = vmax.f32 %v1009_v53, 0.0  ;;  %v1010_v3 = vadd.f32 %v1903_v25, %v971_v55  ;;  %v1578_v8 = vpop.f32.mrb[19].mxu1  ;;  %v867_v9 = vadd.f32 %v1528_v61, %v354_v57  ;;  %v1531_v11 = vadd.f32 %v1530_v6, %v1529_v63 }
 0x11f   : > { %v1057_v2 = vmax.f32 %v1025_v54, 0.0  ;;  %v1026_v4 = vadd.f32 %v1903_v25, %v987_v56  ;;  %v883_v10 = vadd.f32 %v1576_v62, %v370_v59  ;;  %v1579_v12 = vadd.f32 %v1578_v8, %v1577_v0 }
 0x120   : > { %v1458_v13 = vpack.c.bf16 %v1041_v1, %v1041_v1  ;;  %v1042_v16 = vmax.f32 %v1010_v3, 0.0  ;;  %900 = vst.msk [vmem:[#allocation2 + $0x40] sm:$0xff] %vm313_vm0, %v867_v9  ;;  %v868_v20 = vadd.f32 %v1531_v11, %v355_v5 }
 0x121   : > { %v1474_v14 = vpack.c.bf16 %v1057_v2, %v1057_v2  ;;  %v1058_v17 = vmax.f32 %v1026_v4, 0.0  ;;  %v933_v18 = vld [vmem:[#allocation2 + $0x30] sm:$0xff]  ;;  %916 = vst.msk [vmem:[#allocation2 + $0xc0] sm:$0xff] %vm313_vm0, %v883_v10  ;;  %v884_v21 = vadd.f32 %v1579_v12, %v371_v7 }
 0x122   : > { %v949_v19 = vld [vmem:[#allocation2 + $0xb0] sm:$0xff]  ;;  %1202 = vst.msk [vmem:[%s1921_s14 + $0x10] sm:$0xf] %vm1197_vm1, %v1458_v13  ;;  %v1459_v22 = vpack.c.bf16 %v1042_v16, %v1042_v16  ;;  %v972_v24 = vmul.f32 %v1898_v15, %v933_v18  ;;  %v1532_v29 = vpop.f32.mrb[20].mxu0  ;;  %v1580_v30 = vpop.f32.mrb[20].mxu1  ;;  %v358_v18 = vld [vmem:[#allocation2 + $0x60] sm:$0xff] }
 0x123   : > { %1218 = vst.msk [vmem:[%s1921_s14 + $0x50] sm:$0xf] %vm1197_vm1, %v1474_v14  ;;  %v1475_v23 = vpack.c.bf16 %v1058_v17, %v1058_v17  ;;  %v988_v26 = vmul.f32 %v1898_v15, %v949_v19  ;;  %v934_v27 = vld [vmem:[#allocation2 + $0x38] sm:$0xff]  ;;  %v1533_v36 = vpop.f32.mrb[21].mxu0  ;;  %v1581_v38 = vpop.f32.mrb[21].mxu1  ;;  %v374_v19 = vld [vmem:[#allocation2 + $0xe0] sm:$0xff] }
 0x124   : > { %v950_v28 = vld [vmem:[#allocation2 + $0xb8] sm:$0xff]  ;;  %901 = vst.msk [vmem:[#allocation2 + $0x48] sm:$0xff] %vm313_vm0, %v868_v20  ;;  %917 = vst.msk [vmem:[#allocation2 + $0xc8] sm:$0xff] %vm313_vm0, %v884_v21  ;;  %v1011_v31 = vadd.f32 %v1903_v25, %v972_v24  ;;  %v973_v33 = vmul.f32 %v1898_v15, %v934_v27  ;;  %v1534_v39 = vadd.f32 %v1533_v36, %v1532_v29  ;;  %v1535_v41 = vpop.f32.mrb[22].mxu0  ;;  %v1583_v42 = vpop.f32.mrb[22].mxu1 }
 0x125   : > { %1203 = vst.msk [vmem:[%s1921_s14 + $0x14] sm:$0xf] %vm1197_vm1, %v1459_v22  ;;  %1219 = vst.msk [vmem:[%s1921_s14 + $0x54] sm:$0xf] %vm1197_vm1, %v1475_v23  ;;  %v1027_v32 = vadd.f32 %v1903_v25, %v988_v26  ;;  %v989_v34 = vmul.f32 %v1898_v15, %v950_v28  ;;  %v1582_v40 = vadd.f32 %v1581_v38, %v1580_v30  ;;  %v1536_v48 = vpop.f32.mrb[23].mxu0  ;;  %v1584_v50 = vpop.f32.mrb[23].mxu1 }
 0x126   : > { %v1043_v43 = vmax.f32 %v1011_v31, 0.0  ;;  %v1012_v45 = vadd.f32 %v1903_v25, %v973_v33  ;;  %v869_v51 = vadd.f32 %v1534_v39, %v356_v35  ;;  %v1537_v53 = vadd.f32 %v1536_v48, %v1535_v41  ;;  %v359_v31 = vld [vmem:[#allocation2 + $0x68] sm:$0xff] }
 0x127   : > { %v1059_v44 = vmax.f32 %v1027_v32, 0.0  ;;  %v1028_v46 = vadd.f32 %v1903_v25, %v989_v34  ;;  %v885_v52 = vadd.f32 %v1582_v40, %v372_v37  ;;  %v1585_v54 = vadd.f32 %v1584_v50, %v1583_v42  ;;  %v935_v59 = vld [vmem:[#allocation2 + $0x40] sm:$0xff]  ;;  %v375_v32 = vld [vmem:[#allocation2 + $0xe8] sm:$0xff] }
 0x128   : > { %v1460_v55 = vpack.c.bf16 %v1043_v43, %v1043_v43  ;;  %v1044_v57 = vmax.f32 %v1012_v45, 0.0  ;;  %v951_v60 = vld [vmem:[#allocation2 + $0xc0] sm:$0xff]  ;;  %v974_v61 = vmul.f32 %v1898_v15, %v935_v59  ;;  %902 = vst.msk [vmem:[#allocation2 + $0x50] sm:$0xff] %vm313_vm0, %v869_v51  ;;  %v870_v63 = vadd.f32 %v1537_v53, %v357_v47  ;;  %v360_v59 = vld [vmem:[#allocation2 + $0x70] sm:$0xff] }
 0x129   : > { %v1476_v56 = vpack.c.bf16 %v1059_v44, %v1059_v44  ;;  %v1060_v58 = vmax.f32 %v1028_v46, 0.0  ;;  %v990_v62 = vmul.f32 %v1898_v15, %v951_v60  ;;  %918 = vst.msk [vmem:[#allocation2 + $0xd0] sm:$0xff] %vm313_vm0, %v885_v52  ;;  %v886_v0 = vadd.f32 %v1585_v54, %v373_v49  ;;  %v376_v60 = vld [vmem:[#allocation2 + $0xf0] sm:$0xff] }
 0x12a   : > { %1204 = vst.msk [vmem:[%s1921_s14 + $0x18] sm:$0xf] %vm1197_vm1, %v1460_v55  ;;  %v1461_v1 = vpack.c.bf16 %v1044_v57, %v1044_v57  ;;  %v1013_v5 = vadd.f32 %v1903_v25, %v974_v61  ;;  %v1538_v9 = vpop.f32.mrb[24].mxu0  ;;  %v1586_v10 = vpop.f32.mrb[24].mxu1 }
 0x12b   : > { %1220 = vst.msk [vmem:[%s1921_s14 + $0x58] sm:$0xf] %vm1197_vm1, %v1476_v56  ;;  %v1477_v2 = vpack.c.bf16 %v1060_v58, %v1060_v58  ;;  %v936_v3 = vld [vmem:[#allocation2 + $0x48] sm:$0xff]  ;;  %v1029_v6 = vadd.f32 %v1903_v25, %v990_v62  ;;  %v1539_v11 = vpop.f32.mrb[25].mxu0  ;;  %v1587_v12 = vpop.f32.mrb[25].mxu1 }
 0x12c   : > { %v952_v4 = vld [vmem:[#allocation2 + $0xc8] sm:$0xff]  ;;  %v975_v7 = vmul.f32 %v1898_v15, %v936_v3  ;;  %903 = vst.msk [vmem:[#allocation2 + $0x58] sm:$0xff] %vm313_vm0, %v870_v63  ;;  %919 = vst.msk [vmem:[#allocation2 + $0xd8] sm:$0xff] %vm313_vm0, %v886_v0  ;;  %v1045_v13 = vmax.f32 %v1013_v5, 0.0  ;;  %v1541_v20 = vpop.f32.mrb[26].mxu0  ;;  %v1589_v21 = vpop.f32.mrb[26].mxu1  ;;  %v1540_v22 = vadd.f32 %v1539_v11, %v1538_v9  ;;  %v1588_v23 = vadd.f32 %v1587_v12, %v1586_v10 }
 0x12d   : > { %v991_v8 = vmul.f32 %v1898_v15, %v952_v4  ;;  %1205 = vst.msk [vmem:[%s1921_s14 + $0x1c] sm:$0xf] %vm1197_vm1, %v1461_v1  ;;  %1221 = vst.msk [vmem:[%s1921_s14 + $0x5c] sm:$0xf] %vm1197_vm1, %v1477_v2  ;;  %v1061_v14 = vmax.f32 %v1029_v6, 0.0  ;;  %v1542_v24 = vpop.f32.mrb[27].mxu0 }
 0x12e   : > { %v1014_v16 = vadd.f32 %v1903_v25, %v975_v7  ;;  %v1590_v26 = vpop.f32.mrb[27].mxu1  ;;  %v1462_v27 = vpack.c.bf16 %v1045_v13, %v1045_v13  ;;  %v871_v35 = vadd.f32 %v1540_v22, %v358_v18  ;;  %v887_v36 = vadd.f32 %v1588_v23, %v374_v19  ;;  %v361_v7 = vld [vmem:[#allocation2 + $0x78] sm:$0xff] }
 0x12f   : > { %v1030_v17 = vadd.f32 %v1903_v25, %v991_v8  ;;  %v1478_v28 = vpack.c.bf16 %v1061_v14, %v1061_v14  ;;  %v937_v33 = vld [vmem:[#allocation2 + $0x50] sm:$0xff]  ;;  %v1543_v37 = vadd.f32 %v1542_v24, %v1541_v20  ;;  %v1591_v38 = vadd.f32 %v1590_v26, %v1589_v21  ;;  %v377_v8 = vld [vmem:[#allocation2 + $0xf8] sm:$0xff] }
 0x130   : > { %v1046_v29 = vmax.f32 %v1014_v16, 0.0  ;;  %v953_v34 = vld [vmem:[#allocation2 + $0xd0] sm:$0xff]  ;;  %1206 = vst.msk [vmem:[%s1921_s14 + $0x20] sm:$0xf] %vm1197_vm1, %v1462_v27  ;;  %v976_v41 = vmul.f32 %v1898_v15, %v937_v33 }
 0x131   : > { %v1062_v30 = vmax.f32 %v1030_v17, 0.0  ;;  %1222 = vst.msk [vmem:[%s1921_s14 + $0x60] sm:$0xf] %vm1197_vm1, %v1478_v28  ;;  %v992_v42 = vmul.f32 %v1898_v15, %v953_v34  ;;  %v872_v45 = vadd.f32 %v1543_v37, %v359_v31  ;;  %v888_v46 = vadd.f32 %v1591_v38, %v375_v32 }
 0x132   : > { %v1463_v39 = vpack.c.bf16 %v1046_v29, %v1046_v29  ;;  %904 = vst.msk [vmem:[#allocation2 + $0x60] sm:$0xff] %vm313_vm0, %v871_v35  ;;  %920 = vst.msk [vmem:[#allocation2 + $0xe0] sm:$0xff] %vm313_vm0, %v887_v36  ;;  %v1015_v47 = vadd.f32 %v1903_v25, %v976_v41  ;;  %v1544_v51 = vpop.f32.mrb[28].mxu0  ;;  %v1592_v52 = vpop.f32.mrb[28].mxu1 }
 0x133   : > { %v1479_v40 = vpack.c.bf16 %v1062_v30, %v1062_v30  ;;  %v938_v43 = vld [vmem:[#allocation2 + $0x58] sm:$0xff]  ;;  %v1031_v48 = vadd.f32 %v1903_v25, %v992_v42  ;;  %905 = vst.msk [vmem:[#allocation2 + $0x68] sm:$0xff] %vm313_vm0, %v872_v45  ;;  %921 = vst.msk [vmem:[#allocation2 + $0xe8] sm:$0xff] %vm313_vm0, %v888_v46  ;;  %v1545_v53 = vpop.f32.mrb[29].mxu0  ;;  %v1593_v54 = vpop.f32.mrb[29].mxu1 }
 0x134   : > { %v954_v44 = vld [vmem:[#allocation2 + $0xd8] sm:$0xff]  ;;  %1207 = vst.msk [vmem:[%s1921_s14 + $0x24] sm:$0xf] %vm1197_vm1, %v1463_v39  ;;  %v977_v49 = vmul.f32 %v1898_v15, %v938_v43  ;;  %v1047_v55 = vmax.f32 %v1015_v47, 0.0  ;;  %v1547_v61 = vpop.f32.mrb[30].mxu0  ;;  %v1595_v62 = vpop.f32.mrb[30].mxu1  ;;  %v1546_v63 = vadd.f32 %v1545_v53, %v1544_v51  ;;  %v1594_v0 = vadd.f32 %v1593_v54, %v1592_v52 }
 0x135   : > { %1223 = vst.msk [vmem:[%s1921_s14 + $0x64] sm:$0xf] %vm1197_vm1, %v1479_v40  ;;  %v993_v50 = vmul.f32 %v1898_v15, %v954_v44  ;;  %v1063_v56 = vmax.f32 %v1031_v48, 0.0  ;;  %v1548_v1 = vpop.f32.mrb[31].mxu0  ;;  %v1596_v2 = vpop.f32.mrb[31].mxu1 }
 0x136   : > { %v1016_v57 = vadd.f32 %v1903_v25, %v977_v49  ;;  %v1464_v3 = vpack.c.bf16 %v1047_v55, %v1047_v55  ;;  %v873_v9 = vadd.f32 %v1546_v63, %v360_v59  ;;  %v889_v10 = vadd.f32 %v1594_v0, %v376_v60 }
 0x137   : > { %v1032_v58 = vadd.f32 %v1903_v25, %v993_v50  ;;  %v1480_v4 = vpack.c.bf16 %v1063_v56, %v1063_v56  ;;  %v1549_v11 = vadd.f32 %v1548_v1, %v1547_v61  ;;  %v1597_v12 = vadd.f32 %v1596_v2, %v1595_v62 }
 0x138   : > { %v1048_v5 = vmax.f32 %v1016_v57, 0.0  ;;  %1208 = vst.msk [vmem:[%s1921_s14 + $0x28] sm:$0xf] %vm1197_vm1, %v1464_v3 }
 0x139   : > { %v1064_v6 = vmax.f32 %v1032_v58, 0.0  ;;  %1224 = vst.msk [vmem:[%s1921_s14 + $0x68] sm:$0xf] %vm1197_vm1, %v1480_v4  ;;  %v939_v16 = vld [vmem:[#allocation2 + $0x60] sm:$0xff]  ;;  %v874_v20 = vadd.f32 %v1549_v11, %v361_v7  ;;  %v890_v21 = vadd.f32 %v1597_v12, %v377_v8 }
 0x13a   : > { %v1465_v13 = vpack.c.bf16 %v1048_v5, %v1048_v5  ;;  %v955_v17 = vld [vmem:[#allocation2 + $0xe0] sm:$0xff]  ;;  %v978_v18 = vmul.f32 %v1898_v15, %v939_v16  ;;  %906 = vst.msk [vmem:[#allocation2 + $0x70] sm:$0xff] %vm313_vm0, %v873_v9  ;;  %922 = vst.msk [vmem:[#allocation2 + $0xf0] sm:$0xff] %vm313_vm0, %v889_v10  ;;  %v940_v22 = vld [vmem:[#allocation2 + $0x68] sm:$0xff] }
 0x13b   : > { %v1481_v14 = vpack.c.bf16 %v1064_v6, %v1064_v6  ;;  %v994_v19 = vmul.f32 %v1898_v15, %v955_v17  ;;  %v956_v23 = vld [vmem:[#allocation2 + $0xe8] sm:$0xff]  ;;  %v979_v27 = vmul.f32 %v1898_v15, %v940_v22  ;;  %907 = vst.msk [vmem:[#allocation2 + $0x78] sm:$0xff] %vm313_vm0, %v874_v20  ;;  %923 = vst.msk [vmem:[#allocation2 + $0xf8] sm:$0xff] %vm313_vm0, %v890_v21 }
 0x13c   : > { %1209 = vst.msk [vmem:[%s1921_s14 + $0x2c] sm:$0xf] %vm1197_vm1, %v1465_v13  ;;  %v1017_v24 = vadd.f32 %v1903_v25, %v978_v18  ;;  %v995_v28 = vmul.f32 %v1898_v15, %v956_v23 }
 0x13d   : > { %1225 = vst.msk [vmem:[%s1921_s14 + $0x6c] sm:$0xf] %vm1197_vm1, %v1481_v14  ;;  %v1033_v26 = vadd.f32 %v1903_v25, %v994_v19  ;;  %v1018_v31 = vadd.f32 %v1903_v25, %v979_v27 }
 0x13e   : > { %v1049_v29 = vmax.f32 %v1017_v24, 0.0  ;;  %v1034_v32 = vadd.f32 %v1903_v25, %v995_v28 }
 0x13f   : > { %v1065_v30 = vmax.f32 %v1033_v26, 0.0  ;;  %v1050_v35 = vmax.f32 %v1018_v31, 0.0 }
 0x140   : > { %v1466_v33 = vpack.c.bf16 %v1049_v29, %v1049_v29  ;;  %v1066_v36 = vmax.f32 %v1034_v32, 0.0 }
 0x141   : > { %v1482_v34 = vpack.c.bf16 %v1065_v30, %v1065_v30  ;;  %v941_v37 = vld [vmem:[#allocation2 + $0x70] sm:$0xff]  ;;  %v1467_v39 = vpack.c.bf16 %v1050_v35, %v1050_v35 }
 0x142   : > { %v957_v38 = vld [vmem:[#allocation2 + $0xf0] sm:$0xff]  ;;  %1210 = vst.msk [vmem:[%s1921_s14 + $0x30] sm:$0xf] %vm1197_vm1, %v1466_v33  ;;  %v1483_v40 = vpack.c.bf16 %v1066_v36, %v1066_v36  ;;  %v980_v41 = vmul.f32 %v1898_v15, %v941_v37  ;;  %v942_v43 = vld [vmem:[#allocation2 + $0x78] sm:$0xff] }
 0x143   : > { %1226 = vst.msk [vmem:[%s1921_s14 + $0x70] sm:$0xf] %vm1197_vm1, %v1482_v34  ;;  %v996_v42 = vmul.f32 %v1898_v15, %v957_v38  ;;  %v958_v44 = vld [vmem:[#allocation2 + $0xf8] sm:$0xff]  ;;  %1211 = vst.msk [vmem:[%s1921_s14 + $0x34] sm:$0xf] %vm1197_vm1, %v1467_v39  ;;  %v981_v47 = vmul.f32 %v1898_v15, %v942_v43 }
 0x144   : > { %1227 = vst.msk [vmem:[%s1921_s14 + $0x74] sm:$0xf] %vm1197_vm1, %v1483_v40  ;;  %v1019_v45 = vadd.f32 %v1903_v25, %v980_v41  ;;  %v997_v48 = vmul.f32 %v1898_v15, %v958_v44 }
 0x145   : > { %v1035_v46 = vadd.f32 %v1903_v25, %v996_v42  ;;  %v1020_v51 = vadd.f32 %v1903_v25, %v981_v47 }
 0x146   : > { %v1051_v49 = vmax.f32 %v1019_v45, 0.0  ;;  %v1036_v52 = vadd.f32 %v1903_v25, %v997_v48 }
 0x147   : > { %v1067_v50 = vmax.f32 %v1035_v46, 0.0  ;;  %v1052_v55 = vmax.f32 %v1020_v51, 0.0 }
 0x148   : > { %v1468_v53 = vpack.c.bf16 %v1051_v49, %v1051_v49  ;;  %v1068_v56 = vmax.f32 %v1036_v52, 0.0 }
 0x149   : > { %v1484_v54 = vpack.c.bf16 %v1067_v50, %v1067_v50  ;;  %v1469_v57 = vpack.c.bf16 %v1052_v55, %v1052_v55 }
 0x14a   : > { %1212 = vst.msk [vmem:[%s1921_s14 + $0x38] sm:$0xf] %vm1197_vm1, %v1468_v53  ;;  %v1485_v58 = vpack.c.bf16 %v1068_v56, %v1068_v56 }
 0x14b   : > { %1228 = vst.msk [vmem:[%s1921_s14 + $0x78] sm:$0xf] %vm1197_vm1, %v1484_v54  ;;  %1213 = vst.msk [vmem:[%s1921_s14 + $0x3c] sm:$0xf] %vm1197_vm1, %v1469_v57 }
 0x14c   : > { %1229 = vst.msk [vmem:[%s1921_s14 + $0x7c] sm:$0xf] %vm1197_vm1, %v1485_v58 }
 0x14d PF: > { %s14_s17 = sadd.s32 1, %s1725_s17   ;;  %s2081_s15 = smov %s1721_s16 }
 0x14e   : > { %p11_p5 = scmp.ge.s32.totalorder %s14_s17, 4   ;;  %s2082_s16 = smov %s2084_s18 }
 0x150   :  { %13 = sbr.rel (!%p11_p5) target bundleno = 2 (0x2), region = 83 }

</bundles_post_ra>
